<compile_context>
chip_gen: v6e
topology: v6e:2x2x1
jax: 0.10.0
libtpu: 0.0.40
codegen_flags: <defaults>
</compile_context>

<pallas_src>
import jax
import jax.numpy as jnp
from jax import lax
from jax.experimental import pallas as pl
from jax.experimental.pallas import tpu as pltpu


def _round_up(x: int, m: int) -> int:
    return ((x + m - 1) // m) * m


# ---------------------------------------------------------------------------
# Fast path: table resident in VMEM, gather with plain vector loads/stores.
# ---------------------------------------------------------------------------
def embed_vmem_kernel(ids_ref, table_ref, out_ref):
    """ids_ref: (1, tile) int32 SMEM; table_ref: (V, E) VMEM; out_ref: (tile, E) VMEM."""
    tile = out_ref.shape[0]

    def body(c, carry):
        base = pl.multiple_of(c * 8, 8)
        # 8-wide unrolled gather: scalar id loads + dynamic-slice row copies.
        for u in range(8):
            r = base + u
            tok = ids_ref[0, r]
            out_ref[pl.ds(r, 1), :] = table_ref[pl.ds(tok, 1), :]
        return carry

    lax.fori_loop(0, tile // 8, body, 0)


# ---------------------------------------------------------------------------
# Large-table fallback: HBM table, per-row DMA gather, one aggregate wait.
# ---------------------------------------------------------------------------
def embed_dma_kernel(ids_ref, table_ref, out_ref, sem):
    """ids_ref: (1, tile) int32 SMEM; table_ref: (V, E) HBM; out_ref: (tile, E) VMEM."""
    tile = out_ref.shape[0]

    def issue8(c, carry):
        base = pl.multiple_of(c * 8, 8)
        # 8-wide unroll: SMEM id loads / address math co-issue with the
        # one-per-bundle DMA descriptor pushes on the vector-misc slot.
        for u in range(8):
            r = base + u
            tok = ids_ref[0, r]
            pltpu.make_async_copy(
                table_ref.at[pl.ds(tok, 1), :],
                out_ref.at[pl.ds(r, 1), :],
                sem,
            ).start()
        return carry

    lax.fori_loop(0, tile // 8, issue8, 0)

    # Single aggregate drain: the DMA semaphore counts bytes and the `tile`
    # row copies sum to exactly one (tile, E) block, so one descriptor of
    # that size waits for all of them (replaces `tile` dummy (1, E) waits).
    pltpu.make_async_copy(out_ref, out_ref, sem).wait()


# ---------------------------------------------------------------------------
# Wrapper
# ---------------------------------------------------------------------------
def embedder_forward(
    captions,
    embed_table,
    *,
    max_tile_rows: int = 512,
    vmem_table_bytes_limit: int = 4 << 20,
):
    """captions: [B, S] integer ids; embed_table: [V, E]; returns [B, S, E]."""
    B, S = captions.shape
    V, E = embed_table.shape
    itemsize = jnp.dtype(embed_table.dtype).itemsize
    n_rows = B * S

    ids = jnp.clip(captions.reshape(n_rows).astype(jnp.int32), 0, V - 1)

    # Tile sizing: multiple of 8, capped so the double-buffered output tile
    # stays <= ~4 MiB regardless of E / dtype (fits every generation's
    # scoped-VMEM budget with the 32 MiB limit requested below).
    per_row_bytes = E * itemsize
    cap = max(8, min(max_tile_rows, ((4 << 20) // (2 * per_row_bytes)) // 8 * 8))
    tile = max(8, min(cap, _round_up(n_rows, 8)))

    n_pad = _round_up(n_rows, tile)
    if n_pad != n_rows:
        # Padding rows gather (valid) row 0 and are sliced off below.
        ids = jnp.pad(ids, (0, n_pad - n_rows))
    num_tiles = n_pad // tile
    ids2d = ids.reshape(num_tiles, tile)

    # Per-step SMEM id tile (constant SMEM footprint; no whole-array prefetch).
    ids_spec = pl.BlockSpec((1, tile), lambda i: (i, 0),
                            memory_space=pltpu.MemorySpace.SMEM)
    out_spec = pl.BlockSpec((tile, E), lambda i: (i, 0))

    table_bytes = V * E * itemsize
    if table_bytes <= vmem_table_bytes_limit:
        kernel = embed_vmem_kernel
        table_spec = pl.BlockSpec((V, E), lambda i: (0, 0))   # whole table in VMEM
        scratch = []
    else:
        kernel = embed_dma_kernel
        table_spec = pl.BlockSpec(memory_space=pl.ANY)        # table stays in HBM
        scratch = [pltpu.SemaphoreType.DMA(())]

    out_flat = pl.pallas_call(
        kernel,
        out_shape=jax.ShapeDtypeStruct((n_pad, E), embed_table.dtype),
        grid=(num_tiles,),
        in_specs=[ids_spec, table_spec],
        out_specs=out_spec,
        scratch_shapes=scratch,
        compiler_params=pltpu.CompilerParams(
            dimension_semantics=("parallel",),
            vmem_limit_bytes=32 << 20,
        ),
    )(ids2d, embed_table)

    return out_flat[:n_rows].reshape(B, S, E)


if __name__ == "__main__":
    # Small deterministic example: batch=2, seq=8, vocab=512, embed_size=128
    # (embed dim a multiple of 128 so the output blocks are lane-dense).
    B, S, VOCAB, EMBED = 2, 8, 512, 128

    key = jax.random.PRNGKey(0)
    k_ids, k_tbl = jax.random.split(key)

    captions = jax.random.randint(k_ids, (B, S), 0, VOCAB, dtype=jnp.int32)
    embed_table = (0.02 * jax.random.normal(k_tbl, (VOCAB, EMBED))).astype(jnp.float32)

    ref = jnp.take(embed_table, captions, axis=0)

    # Default dispatch: 512x128 f32 table (256 KiB) -> VMEM-resident fast path.
    out_fast = jax.block_until_ready(embedder_forward(captions, embed_table))
    assert out_fast.shape == (B, S, EMBED), out_fast.shape
    assert jnp.array_equal(out_fast, ref), "fast path mismatch vs reference gather"

    # Force the large-vocab HBM DMA-gather fallback on the same small inputs.
    out_dma = jax.block_until_ready(
        embedder_forward(captions, embed_table, vmem_table_bytes_limit=0))
    assert jnp.array_equal(out_dma, ref), "DMA path mismatch vs reference gather"

    print("KERNEL_OK")
</pallas_src>

<mosaic_0001>
module attributes {stable_mosaic.version = 11 : i64} {
  func.func @embed_vmem_kernel(%arg0: i32, %arg1: memref<1x16xi32, #tpu.memory_space<smem>>, %arg2: memref<512x128xf32, #tpu.memory_space<vmem>>, %arg3: memref<16x128xf32, #tpu.memory_space<vmem>>) attributes {dimension_semantics = [#tpu.dimension_semantics<parallel>], iteration_bounds = array<i64: 1>, scalar_prefetch = 0 : i64, scratch_operands = 0 : i64, tpu.core_type = #tpu.core_type<tc>, window_params = [{transform_indices = @transform_0, window_bounds = array<i64: 1, 16>}, {pipeline_mode = #tpu.pipeline_mode<synchronous>, transform_indices = @transform_1, window_bounds = array<i64: 512, 128>}, {transform_indices = @transform_2, window_bounds = array<i64: 16, 128>}]} {
    %c0_i32 = arith.constant 0 : i32
    %c2_i32 = arith.constant 2 : i32
    %0 = arith.addi %c0_i32, %c2_i32 : i32
    %c1_i32 = arith.constant 1 : i32
    scf.for %arg4 = %c0_i32 to %0 step %c1_i32  : i32 {
      %c8_i32 = arith.constant 8 : i32
      %1 = arith.muli %arg4, %c8_i32 : i32
      %2 = tpu.assume_multiple %1, 8 : i32
      %c0_i32_1 = arith.constant 0 : i32
      %3 = arith.addi %2, %c0_i32_1 : i32
      %c0 = arith.constant 0 : index
      %4 = arith.index_cast %3 : i32 to index
      %5 = memref.load %arg1[%c0, %4] : memref<1x16xi32, #tpu.memory_space<smem>>
      %6 = arith.index_cast %5 : i32 to index
      %c0_2 = arith.constant 0 : index
      %7 = vector.load %arg2[%6, %c0_2] : memref<512x128xf32, #tpu.memory_space<vmem>>, vector<1x128xf32>
      %8 = arith.index_cast %3 : i32 to index
      %c0_3 = arith.constant 0 : index
      %9 = vector.load %arg3[%8, %c0_3] : memref<16x128xf32, #tpu.memory_space<vmem>>, vector<1x128xf32>
      tpu.vector_store %arg3[%8, %c0_3], %7 {strides = array<i32>} : memref<16x128xf32, #tpu.memory_space<vmem>>, vector<1x128xf32>,
      %c1_i32_4 = arith.constant 1 : i32
      %10 = arith.addi %2, %c1_i32_4 : i32
      %c0_5 = arith.constant 0 : index
      %11 = arith.index_cast %10 : i32 to index
      %12 = memref.load %arg1[%c0_5, %11] : memref<1x16xi32, #tpu.memory_space<smem>>
      %13 = arith.index_cast %12 : i32 to index
      %c0_6 = arith.constant 0 : index
      %14 = vector.load %arg2[%13, %c0_6] : memref<512x128xf32, #tpu.memory_space<vmem>>, vector<1x128xf32>
      %15 = arith.index_cast %10 : i32 to index
      %c0_7 = arith.constant 0 : index
      %16 = vector.load %arg3[%15, %c0_7] : memref<16x128xf32, #tpu.memory_space<vmem>>, vector<1x128xf32>
      tpu.vector_store %arg3[%15, %c0_7], %14 {strides = array<i32>} : memref<16x128xf32, #tpu.memory_space<vmem>>, vector<1x128xf32>,
      %c2_i32_8 = arith.constant 2 : i32
      %17 = arith.addi %2, %c2_i32_8 : i32
      %c0_9 = arith.constant 0 : index
      %18 = arith.index_cast %17 : i32 to index
      %19 = memref.load %arg1[%c0_9, %18] : memref<1x16xi32, #tpu.memory_space<smem>>
      %20 = arith.index_cast %19 : i32 to index
      %c0_10 = arith.constant 0 : index
      %21 = vector.load %arg2[%20, %c0_10] : memref<512x128xf32, #tpu.memory_space<vmem>>, vector<1x128xf32>
      %22 = arith.index_cast %17 : i32 to index
      %c0_11 = arith.constant 0 : index
      %23 = vector.load %arg3[%22, %c0_11] : memref<16x128xf32, #tpu.memory_space<vmem>>, vector<1x128xf32>
      tpu.vector_store %arg3[%22, %c0_11], %21 {strides = array<i32>} : memref<16x128xf32, #tpu.memory_space<vmem>>, vector<1x128xf32>,
      %c3_i32 = arith.constant 3 : i32
      %24 = arith.addi %2, %c3_i32 : i32
      %c0_12 = arith.constant 0 : index
      %25 = arith.index_cast %24 : i32 to index
      %26 = memref.load %arg1[%c0_12, %25] : memref<1x16xi32, #tpu.memory_space<smem>>
      %27 = arith.index_cast %26 : i32 to index
      %c0_13 = arith.constant 0 : index
      %28 = vector.load %arg2[%27, %c0_13] : memref<512x128xf32, #tpu.memory_space<vmem>>, vector<1x128xf32>
      %29 = arith.index_cast %24 : i32 to index
      %c0_14 = arith.constant 0 : index
      %30 = vector.load %arg3[%29, %c0_14] : memref<16x128xf32, #tpu.memory_space<vmem>>, vector<1x128xf32>
      tpu.vector_store %arg3[%29, %c0_14], %28 {strides = array<i32>} : memref<16x128xf32, #tpu.memory_space<vmem>>, vector<1x128xf32>,
      %c4_i32 = arith.constant 4 : i32
      %31 = arith.addi %2, %c4_i32 : i32
      %c0_15 = arith.constant 0 : index
      %32 = arith.index_cast %31 : i32 to index
      %33 = memref.load %arg1[%c0_15, %32] : memref<1x16xi32, #tpu.memory_space<smem>>
      %34 = arith.index_cast %33 : i32 to index
      %c0_16 = arith.constant 0 : index
      %35 = vector.load %arg2[%34, %c0_16] : memref<512x128xf32, #tpu.memory_space<vmem>>, vector<1x128xf32>
      %36 = arith.index_cast %31 : i32 to index
      %c0_17 = arith.constant 0 : index
      %37 = vector.load %arg3[%36, %c0_17] : memref<16x128xf32, #tpu.memory_space<vmem>>, vector<1x128xf32>
      tpu.vector_store %arg3[%36, %c0_17], %35 {strides = array<i32>} : memref<16x128xf32, #tpu.memory_space<vmem>>, vector<1x128xf32>,
      %c5_i32 = arith.constant 5 : i32
      %38 = arith.addi %2, %c5_i32 : i32
      %c0_18 = arith.constant 0 : index
      %39 = arith.index_cast %38 : i32 to index
      %40 = memref.load %arg1[%c0_18, %39] : memref<1x16xi32, #tpu.memory_space<smem>>
      %41 = arith.index_cast %40 : i32 to index
      %c0_19 = arith.constant 0 : index
      %42 = vector.load %arg2[%41, %c0_19] : memref<512x128xf32, #tpu.memory_space<vmem>>, vector<1x128xf32>
      %43 = arith.index_cast %38 : i32 to index
      %c0_20 = arith.constant 0 : index
      %44 = vector.load %arg3[%43, %c0_20] : memref<16x128xf32, #tpu.memory_space<vmem>>, vector<1x128xf32>
      tpu.vector_store %arg3[%43, %c0_20], %42 {strides = array<i32>} : memref<16x128xf32, #tpu.memory_space<vmem>>, vector<1x128xf32>,
      %c6_i32 = arith.constant 6 : i32
      %45 = arith.addi %2, %c6_i32 : i32
      %c0_21 = arith.constant 0 : index
      %46 = arith.index_cast %45 : i32 to index
      %47 = memref.load %arg1[%c0_21, %46] : memref<1x16xi32, #tpu.memory_space<smem>>
      %48 = arith.index_cast %47 : i32 to index
      %c0_22 = arith.constant 0 : index
      %49 = vector.load %arg2[%48, %c0_22] : memref<512x128xf32, #tpu.memory_space<vmem>>, vector<1x128xf32>
      %50 = arith.index_cast %45 : i32 to index
      %c0_23 = arith.constant 0 : index
      %51 = vector.load %arg3[%50, %c0_23] : memref<16x128xf32, #tpu.memory_space<vmem>>, vector<1x128xf32>
      tpu.vector_store %arg3[%50, %c0_23], %49 {strides = array<i32>} : memref<16x128xf32, #tpu.memory_space<vmem>>, vector<1x128xf32>,
      %c7_i32 = arith.constant 7 : i32
      %52 = arith.addi %2, %c7_i32 : i32
      %c0_24 = arith.constant 0 : index
      %53 = arith.index_cast %52 : i32 to index
      %54 = memref.load %arg1[%c0_24, %53] : memref<1x16xi32, #tpu.memory_space<smem>>
      %55 = arith.index_cast %54 : i32 to index
      %c0_25 = arith.constant 0 : index
      %56 = vector.load %arg2[%55, %c0_25] : memref<512x128xf32, #tpu.memory_space<vmem>>, vector<1x128xf32>
      %57 = arith.index_cast %52 : i32 to index
      %c0_26 = arith.constant 0 : index
      %58 = vector.load %arg3[%57, %c0_26] : memref<16x128xf32, #tpu.memory_space<vmem>>, vector<1x128xf32>
      tpu.vector_store %arg3[%57, %c0_26], %56 {strides = array<i32>} : memref<16x128xf32, #tpu.memory_space<vmem>>, vector<1x128xf32>,
    }
    %c2_i32_0 = arith.constant 2 : i32
    return
  }
  func.func @transform_0(%arg0: i32) -> (i32, i32) {
    %c0_i32 = arith.constant 0 : i32
    %c0_i32_0 = arith.constant 0 : i32
    return %arg0, %c0_i32 : i32, i32
  }
  func.func @transform_1(%arg0: i32) -> (i32, i32) {
    %c0_i32 = arith.constant 0 : i32
    %c0_i32_0 = arith.constant 0 : i32
    %c0_i32_1 = arith.constant 0 : i32
    return %c0_i32, %c0_i32_0 : i32, i32
  }
  func.func @transform_2(%arg0: i32) -> (i32, i32) {
    %c0_i32 = arith.constant 0 : i32
    %c0_i32_0 = arith.constant 0 : i32
    return %arg0, %c0_i32 : i32, i32
  }
}

</mosaic_0001>

<bundles_post_ra>
// kernel: tpu_custom_call.1
= control target key start
LH: loop header
LB: loop body
LE: loop exit
PB: predicated region body
PF: predicated region fallthrough
CT: control target
= control target key end

     0   :  { %7 = vsyncpa [#allocation5], 0  ;;  %s279_s0 = inlined_call_operand.hbm [shape: s32[1,16], index: 0, kind: input, shape index: {}]   ;;  %s280_s1 = inlined_call_operand.hbm [shape: f32[512,128], index: 1, kind: input, shape index: {}]   ;;  %s281_s2 = inlined_call_operand.hbm [shape: f32[16,128], index: 2, kind: output, shape index: {}]  }
   0x1   :  { %8 = vsyncpa [#allocation3], 0 }
   0x2   :  { %9 = vsyncpa [#allocation4], 0  ;;  %s235_s9 = smov [#allocation2]   ;;  %s236_s12 = smov [#allocation6]  }
   0x3   :  { %17 = dma.hbm_to_smem %s279_s0, 16, %s235_s9, [#allocation5]  }
   0x4   :  { %s23_s13 = sshll.u32 %s236_s12, 4  ;;  %s24_s13 = int_to_ptr.vmem [resolvable:$true] %s23_s13 }
   0x5   :  { %s189_s14 = scalar_lea.vmem %s24_s13, 8192  ;;  %p194_p1 = scmp.lt.s32.totalorder %s24_s13, %s24_s13 }
   0x6   :  { %p190_p0 = scmp.ne.s32.totalorder %s24_s13, %s189_s14  ;;  %p195_p2 = scmp.lt.s32.totalorder %s189_s14, %s189_s14 }
   0x8   :  { %p196_p3 = por %p195_p2, %p194_p1 }
   0xa   :  { %p197_p4 = pnand %p196_p3, %p190_p0 }
   0xc   :  { %200 = shalt.err (!%p197_p4)
}
   0xd   :  { %s237_s15 = smov 128   ;;  %s238_s16 = smov 8  }
   0xe   :  { %29 = dma.hbm_to_vmem [thread:$0]  %s280_s1, 8192, %s24_s13, [#allocation3], %s237_s15, %s237_s15, %s238_s16  }
   0xf   :  { %225 = dma.done.wait [#allocation5], 16  }
  0x10   :  { %226 = vsyncadd [#allocation5], 4294967280 }
  0x11   :  { %227 = dma.done.wait [#allocation3], 8192  }
  0x12   :  { %228 = vsyncadd [#allocation3], 4294959104 }
  0x13   :  { %36 = sfence }
  0x14   :  { %s264_s0 = smov 0  }
  0x15 LB: > { %s145_s19 = sshll.u32 %s233_s0, 3  ;;  %s42_s0 = sadd.s32 1, %s233_s0   ;;  %s233_s0 = sphi %s264_s0, %s42_s0  }
  0x16   : > { %s44_s20 = sld [smem:[#allocation2 + %s145_s19]]  ;;  %s49_s21 = sadd.s32 1, %s145_s19 }
  0x17   : > { %s55_s22 = sadd.s32 2, %s145_s19  ;;  %s50_s23 = sld [smem:[#allocation2 + %s49_s21]] }
  0x18   : > { %s61_s24 = sadd.s32 3, %s145_s19  ;;  %s56_s1 = sld [smem:[#allocation2 + %s55_s22]] }
  0x19   : > { %s67_s25 = sadd.s32 4, %s145_s19  ;;  %s62_s26 = sld [smem:[#allocation2 + %s61_s24]] }
  0x1a   : > { %s73_s27 = sadd.s32 5, %s145_s19  ;;  %s68_s28 = sld [smem:[#allocation2 + %s67_s25]] }
  0x1b   : > { %s79_s29 = sadd.s32 6, %s145_s19  ;;  %s74_s30 = sld [smem:[#allocation2 + %s73_s27]] }
  0x1c   : > { %s45_s3 = scalar_lea.vmem [#allocation6], %s44_s20  ;;  %s80_s4 = sld [smem:[#allocation2 + %s79_s29]] }
  0x1d   : > { %v46_v0 = vld [vmem:[%s45_s3] sm:$0x1]  ;;  %s85_s5 = sadd.s32 7, %s145_s19  ;;  %s47_s6 = scalar_lea.vmem [#allocation7], %s145_s19 }
  0x1e   : > { %48 = vst [vmem:[%s47_s6] sm:$0x1] %v46_v0  ;;  %s86_s7 = sld [smem:[#allocation2 + %s85_s5]]  ;;  %s51_s8 = scalar_lea.vmem [#allocation6], %s50_s23 }
  0x1f   : > { %v52_v1 = vld [vmem:[%s51_s8] sm:$0x1]  ;;  %s57_s9 = scalar_lea.vmem [#allocation6], %s56_s1  ;;  %s63_s10 = scalar_lea.vmem [#allocation6], %s62_s26 }
  0x20   : > { %147 = vst [vmem:[%s47_s6 + $0x1] sm:$0x1] %v52_v1  ;;  %v58_v2 = vld [vmem:[%s57_s9] sm:$0x1]  ;;  %s69_s11 = scalar_lea.vmem [#allocation6], %s68_s28  ;;  %p39_p5 = scmp.ge.s32.totalorder %s42_s0, 2  }
  0x21   : > { %149 = vst [vmem:[%s47_s6 + $0x2] sm:$0x1] %v58_v2  ;;  %v64_v3 = vld [vmem:[%s63_s10] sm:$0x1]  ;;  %s75_s12 = scalar_lea.vmem [#allocation6], %s74_s30  ;;  %s239_s17 = smov (%p39_p5), [#allocation7]  }
  0x22   : > { %151 = vst [vmem:[%s47_s6 + $0x3] sm:$0x1] %v64_v3  ;;  %v70_v4 = vld [vmem:[%s69_s11] sm:$0x1]  ;;  %s81_s13 = scalar_lea.vmem [#allocation6], %s80_s4  ;;  %41 = sbr.rel (!%p39_p5) target bundleno = 21 (0x15), region = 59 }
  0x23   : > { %153 = vst [vmem:[%s47_s6 + $0x4] sm:$0x1] %v70_v4  ;;  %v76_v5 = vld [vmem:[%s75_s12] sm:$0x1]  ;;  %s96_s18 = sshll.u32 (%p39_p5), %s239_s17, 4  ;;  %s97_s18 = int_to_ptr.vmem [resolvable:$true] %s96_s18 }
  0x24   : > { %155 = vst [vmem:[%s47_s6 + $0x5] sm:$0x1] %v76_v5  ;;  %v82_v6 = vld [vmem:[%s81_s13] sm:$0x1]  ;;  %s87_s14 = scalar_lea.vmem [#allocation6], %s86_s7  ;;  %s201_s19 = scalar_lea.vmem (%p39_p5), %s97_s18, 256 }
  0x25   : > { %157 = vst [vmem:[%s47_s6 + $0x6] sm:$0x1] %v82_v6  ;;  %v88_v7 = vld [vmem:[%s87_s14] sm:$0x1]  ;;  %p202_p6 = scmp.ne.s32.totalorder (%p39_p5), %s97_s18, %s201_s19  ;;  %p206_p7 = scmp.lt.s32.totalorder (%p39_p5), %s97_s18, %s97_s18 }
  0x26   : > { %159 = vst [vmem:[%s47_s6 + $0x7] sm:$0x1] %v88_v7  ;;  %p207_p8 = scmp.lt.s32.totalorder (%p39_p5), %s201_s19, %s201_s19 }
  0x28   :  { %p208_p9 = por %p207_p8, %p206_p7 }
  0x2a   :  { %p209_p10 = pnand %p208_p9, %p202_p6 }
  0x2c   :  { %212 = shalt.err (!%p209_p10)
}
  0x2d   :  { %102 = dma.vmem_to_hbm [thread:$0]  %s97_s18, 256, %s281_s2, [#allocation4], %s237_s15, %s237_s15, %s238_s16  }
  0x2e   :  { %229 = dma.done.wait [#allocation4], 256  }
  0x2f   :  { %230 = vsyncadd [#allocation4], 4294967040 }
  0x30   :  { %106 = vsyncpa [#allocation3], 1 }
  0x31   :  { %107 = vsyncpa [#allocation4], 1 }
  0x32   :  { %108 = vsyncpa [#allocation5], 1 }

</bundles_post_ra>
